<compile_context>
chip_gen: v5e
topology: v5e:2x2
jax: 0.10.0
libtpu: 0.0.40
codegen_flags: <defaults>
</compile_context>

<pallas_src>
import math

import jax
import jax.numpy as jnp
from jax.experimental import pallas as pl
from jax.experimental.pallas import tpu as pltpu


def _stochastic_depth_kernel(scale_ref, x_ref, o_ref):
    # scale_ref: SMEM (B,) float32, scalar-prefetched; 0.0 or 1/(1-p) per row.
    # x_ref / o_ref: VMEM (1, S_TILE, LANE) tile for (batch row, chunk).
    b = pl.program_id(0)
    s = scale_ref[b].astype(x_ref.dtype)
    o_ref[...] = x_ref[...] * s


def _plan_tiling(n, itemsize):
    """Pick (lane, s_tile, num_chunks, n_padded) for an n-element row payload.

    lane is a multiple of 128 (wider when it divides n exactly), s_tile a
    multiple of 8, block bytes ~<= 2 MiB so 4x (in+out, double-buffered)
    fits every generation's default scoped VMEM with headroom.
    """
    target_block_bytes = 2 * 1024 * 1024

    lane = 128
    for cand in (2048, 1024, 512, 256, 128):
        if n % (8 * cand) == 0:          # zero padding, sublane-full layout
            lane = cand
            break

    rows = -(-n // lane)                 # ceil
    max_rows = max(8, (target_block_bytes // (lane * itemsize)) // 8 * 8)

    s_tile = None
    if rows % 8 == 0:
        # Prefer an exact divisor of rows (multiple of 8) -> no row padding.
        for cand in range(min(max_rows, rows), 7, -8):
            if rows % cand == 0:
                s_tile = cand
                break
    if s_tile is None:
        s_tile = min(max_rows, -(-rows // 8) * 8)

    num_chunks = -(-rows // s_tile)
    rows_padded = num_chunks * s_tile
    return lane, s_tile, num_chunks, rows_padded * lane


def stochastic_depth(x, key, prob, mode="batch", training=True):
    """Functional equivalent of the PyTorch StochasticDepth.forward."""
    if mode not in ("row", "batch"):
        raise ValueError(f"mode must be 'row' or 'batch', got {mode!r}")
    if not (0.0 <= prob <= 1.0):
        raise ValueError(f"prob must be in [0, 1], got {prob}")

    if (not training) or prob == 0.0:
        return x
    if prob >= 1.0:                      # always drop; avoids 1/(1-p) div-by-zero
        return jnp.zeros_like(x)

    B = x.shape[0]
    n = math.prod(x.shape[1:])
    itemsize = jnp.dtype(x.dtype).itemsize

    # Per-row keep/scale factor, precomputed in the wrapper (no in-kernel RNG needed).
    if mode == "row":
        u = jax.random.uniform(key, (B,), dtype=jnp.float32)
    else:  # batch: a single decision shared by every row
        u = jnp.broadcast_to(jax.random.uniform(key, (1,), dtype=jnp.float32), (B,))
    scale = jnp.where(u > prob, 1.0 / (1.0 - prob), 0.0).astype(jnp.float32)

    # Lane-dense retiling of each row's payload.
    lane, s_tile, num_chunks, n_padded = _plan_tiling(n, itemsize)
    rows_padded = n_padded // lane

    x_flat = x.reshape(B, n)
    if n_padded > n:
        x_flat = jnp.pad(x_flat, ((0, 0), (0, n_padded - n)))
    x_r = x_flat.reshape(B, rows_padded, lane)

    cost = pl.CostEstimate(
        flops=B * n,
        transcendentals=0,
        bytes_accessed=2 * B * n * itemsize,
    )

    def _run(xr):
        return pl.pallas_call(
            _stochastic_depth_kernel,
            out_shape=jax.ShapeDtypeStruct((B, rows_padded, lane), x.dtype),
            grid_spec=pltpu.PrefetchScalarGridSpec(
                num_scalar_prefetch=1,
                grid=(B, num_chunks),
                in_specs=[
                    pl.BlockSpec((1, s_tile, lane), lambda b, c, sc: (b, c, 0)),
                ],
                out_specs=pl.BlockSpec((1, s_tile, lane), lambda b, c, sc: (b, c, 0)),
            ),
            compiler_params=pltpu.CompilerParams(
                dimension_semantics=("parallel", "parallel"),
            ),
            cost_estimate=cost,
        )(scale, xr)

    if mode == "batch":
        # Whole batch dropped -> skip reading x entirely (zero-fill only).
        out_r = jax.lax.cond(scale[0] > 0.0, _run, lambda xr: jnp.zeros_like(xr), x_r)
    else:
        out_r = _run(x_r)

    out = out_r.reshape(B, n_padded)[:, :n]
    return out.reshape(x.shape)


def _reference(x, u, prob, mode):
    """Pure-JAX reference matching the PyTorch semantics, given the same uniforms."""
    B = x.shape[0]
    if prob >= 1.0:
        return jnp.zeros_like(x)
    if mode == "row":
        r = u.reshape((B,) + (1,) * (x.ndim - 1))
    else:
        r = u[:1].reshape((1,) * x.ndim)
    mask = (r > prob).astype(x.dtype) / (1.0 - prob)
    return x * mask


if __name__ == "__main__":
    key = jax.random.PRNGKey(0)
    kx, ku_row, ku_batch, kx2 = jax.random.split(key, 4)

    B, C, H, W = 2, 4, 16, 16
    x = jax.random.normal(kx, (B, C, H, W), dtype=jnp.float32)
    prob = 0.3

    ok = True

    # --- row mode ---
    out_row = stochastic_depth(x, ku_row, prob, mode="row", training=True)
    jax.block_until_ready(out_row)
    u_row = jax.random.uniform(ku_row, (B,), dtype=jnp.float32)
    ok &= bool(jnp.allclose(out_row, _reference(x, u_row, prob, "row"),
                            atol=1e-6, rtol=1e-6))

    # --- batch mode ---
    out_batch = stochastic_depth(x, ku_batch, prob, mode="batch", training=True)
    jax.block_until_ready(out_batch)
    u_batch = jnp.broadcast_to(
        jax.random.uniform(ku_batch, (1,), dtype=jnp.float32), (B,))
    ok &= bool(jnp.allclose(out_batch, _reference(x, u_batch, prob, "batch"),
                            atol=1e-6, rtol=1e-6))

    # --- awkward shape (exercises the padded lane-dense layout) ---
    x2 = jax.random.normal(kx2, (2, 3, 5, 7), dtype=jnp.float32)
    out2 = stochastic_depth(x2, ku_row, prob, mode="row", training=True)
    jax.block_until_ready(out2)
    u2 = jax.random.uniform(ku_row, (2,), dtype=jnp.float32)
    ok &= bool(jnp.allclose(out2, _reference(x2, u2, prob, "row"),
                            atol=1e-6, rtol=1e-6))

    # --- prob == 1.0: always drop ---
    out_p1 = stochastic_depth(x, ku_row, 1.0, mode="row", training=True)
    jax.block_until_ready(out_p1)
    ok &= bool(jnp.array_equal(out_p1, jnp.zeros_like(x)))

    # --- eval mode / prob == 0 passthrough ---
    out_eval = stochastic_depth(x, ku_row, prob, mode="row", training=False)
    ok &= bool(jnp.array_equal(out_eval, x))
    out_p0 = stochastic_depth(x, ku_row, 0.0, mode="row", training=True)
    ok &= bool(jnp.array_equal(out_p0, x))

    if ok:
        print("KERNEL_OK")
    else:
        print("KERNEL_MISMATCH")
</pallas_src>

<mosaic_0001>
module attributes {stable_mosaic.version = 11 : i64} {
  func.func @_stochastic_depth_kernel(%arg0: i32, %arg1: i32, %arg2: memref<2xf32, #tpu.memory_space<smem>>, %arg3: memref<1x8x128xf32, #tpu.memory_space<vmem>>, %arg4: memref<1x8x128xf32, #tpu.memory_space<vmem>>) attributes {dimension_semantics = [#tpu.dimension_semantics<parallel>, #tpu.dimension_semantics<parallel>], iteration_bounds = array<i64: 2, 1>, scalar_prefetch = 1 : i64, scratch_operands = 0 : i64, tpu.core_type = #tpu.core_type<tc>, window_params = [{transform_indices = @transform_0, window_bounds = array<i64: 1, 8, 128>}, {transform_indices = @transform_1, window_bounds = array<i64: 1, 8, 128>}]} {
    %0 = arith.index_cast %arg0 : i32 to index
    %1 = memref.load %arg2[%0] : memref<2xf32, #tpu.memory_space<smem>>
    %c0 = arith.constant 0 : index
    %c0_0 = arith.constant 0 : index
    %c0_1 = arith.constant 0 : index
    %2 = vector.load %arg3[%c0, %c0_0, %c0_1] : memref<1x8x128xf32, #tpu.memory_space<vmem>>, vector<1x8x128xf32>
    %3 = vector.broadcast %1 : f32 to vector<1x8x128xf32>
    %4 = arith.mulf %2, %3 : vector<1x8x128xf32>
    %c0_2 = arith.constant 0 : index
    %c0_3 = arith.constant 0 : index
    %c0_4 = arith.constant 0 : index
    %5 = vector.load %arg4[%c0_2, %c0_3, %c0_4] : memref<1x8x128xf32, #tpu.memory_space<vmem>>, vector<1x8x128xf32>
    tpu.vector_store %arg4[%c0_2, %c0_3, %c0_4], %4 {strides = array<i32>} : memref<1x8x128xf32, #tpu.memory_space<vmem>>, vector<1x8x128xf32>,
    return
  }
  func.func @transform_0(%arg0: i32, %arg1: i32, %arg2: memref<2xf32, #tpu.memory_space<smem>>) -> (i32, i32, i32) {
    %c0_i32 = arith.constant 0 : i32
    %c0_i32_0 = arith.constant 0 : i32
    return %arg0, %arg1, %c0_i32 : i32, i32, i32
  }
  func.func @transform_1(%arg0: i32, %arg1: i32, %arg2: memref<2xf32, #tpu.memory_space<smem>>) -> (i32, i32, i32) {
    %c0_i32 = arith.constant 0 : i32
    %c0_i32_0 = arith.constant 0 : i32
    return %arg0, %arg1, %c0_i32 : i32, i32, i32
  }
}

</mosaic_0001>

<bundles_post_ra>
// kernel: tpu_custom_call.1
= control target key start
LH: loop header
LB: loop body
LE: loop exit
PB: predicated region body
PF: predicated region fallthrough
CT: control target
= control target key end

     0   :  { %s466_s12 = smov [#allocation3]   ;;  %s606_s0 = inlined_call_operand.hbm [shape: f32[2], index: 0, kind: input, shape index: {}]   ;;  %s607_s1 = inlined_call_operand.hbm [shape: f32[2,8,128], index: 1, kind: input, shape index: {}]   ;;  %s608_s2 = inlined_call_operand.hbm [shape: f32[2,8,128], index: 2, kind: output, shape index: {}]  }
   0x1   :  { %s8_s11 = sshll.u32 %s606_s0, 4  ;;  %s9_s11 = int_to_ptr.hbm [resolvable:$true] %s8_s11 }
   0x2   :  { %11 = dma.hbm_to_smem %s9_s11, 16, %s466_s12, [#allocation2] }
   0x3   :  { %432 = dma.done.wait [#allocation2], 16 }
   0x4   :  { %433 = vsyncadd [#allocation2], 4294967280 }
   0x5   :  { %14 = sfence }
   0x6   :  { %15 = vsyncpa [#allocation5], 0 }
   0x7   :  { %17 = vsyncpa [#allocation5 + $0x1], 0 }
   0x8   :  { %18 = vsyncpa [#allocation6], 0 }
   0x9   :  { %20 = vsyncpa [#allocation6 + $0x1], 0  ;;  %s485_s13 = smov 0   ;;  %s487_s14 = smov 0  }
   0xa   :  { %s489_s15 = smov 0   ;;  %s491_s16 = smov 0  }
   0xb   :  { %s493_s17 = smov 0   ;;  %s495_s0 = smov 0  }
   0xc LB: > { %s262_s18 = sadd.s32 4294967295, %s464_s0   ;;  %s263_s19 = sadd.s32 4294967294, %s464_s0   ;;  %s464_s0 = sphi %s495_s0, %s26_s0   ;;  %s460_s17 = sphi %s493_s17, %s617_s17   ;;  %s456_s16 = sphi %s491_s16, %s616_s16   ;;  %s452_s15 = sphi %s489_s15, %s615_s15   ;;  %s448_s14 = sphi %s487_s14, %s614_s14   ;;  %s444_s13 = sphi %s485_s13, %s613_s13  }
   0xd   : > { %s38_s20 = sadd.s32 1, %s460_s17  ;;  %s47_s21 = sadd.s32 1, %s452_s15 }
   0xe   : > { %p40_p0 = scmp.ge.s32.totalorder %s38_s20, 2  ;;  %p54_p1 = scmp.ne.s32.totalorder %s452_s15, %s448_s14 }
   0xf   : > { %p55_p2 = scmp.eq.s32.totalorder %s464_s0, 0  ;;  %p60_p3 = scmp.ne.s32.totalorder %s448_s14, %s444_s13 }
  0x10   : > { %s619_s20 = smov (%p40_p0, %s38_s20), 0  ;;  %p61_p5 = scmp.eq.s32.totalorder %s262_s18, 0 }
  0x11   : > { %p526_p4 = por %p55_p2, %p54_p1  ;;  %s42_s23 = ssub.s32 %s460_s17, %s619_s20 }
  0x12   : > { %p86_p6 = scmp.eq.s32.totalorder %s262_s18, 1  ;;  %p45_p7 = scmp.eq.s32.totalorder %s42_s23, 0 }
  0x13   : > { %p532_p8 = por %p61_p5, %p60_p3  ;;  %p92_p10 = scmp.eq.s32.totalorder %s263_s19, 1 }
  0x14   : > { %p536_p9 = por %p86_p6, %p54_p1  ;;  %p265_p12 = scmp.ge.s32.totalorder %s464_s0, 2 }
  0x15   : > { %s541_s26 = scalar_select %p45_p7, %s452_s15, %s47_s21  }
  0x16   : > { %p543_p11 = por %p92_p10, %p60_p3  ;;  %p287_p13 = scmp.lt.s32.totalorder %s464_s0, 2 }
  0x17   : > { %s112_s28 = sand.u32 1, %s452_s15   ;;  %s267_s30 = sshll.u32 %s460_s17, 3 }
  0x18   : > { %s266_s29 = sshll.u32 %s112_s28, 3  ;;  %s121_s5 = scalar_lea.hbm %s607_s1, %s267_s30 }
  0x19   : > { %s116_s6 = scalar_lea.vmem [#allocation4], %s266_s29  ;;  %s123_s8 = sshll.u32 %s121_s5, 4  ;;  %s124_s8 = int_to_ptr.hbm [resolvable:$true] %s123_s8 }
  0x1a   : > { %s125_s7 = sshll.u32 %s116_s6, 4  ;;  %p280_p0 = pnand %p287_p13, %p526_p4  ;;  %s126_s7 = int_to_ptr.vmem [resolvable:$true] %s125_s7 }
  0x1b   : > { %p268_p1 = scmp.ge.s32.totalorder %s464_s0, 1  ;;  %p130_p2 = scmp.lt.s32.totalorder %s464_s0, 3 }
  0x1c   : > { %s113_s9 = scalar_lea.sflag [#allocation5], %s112_s28 }
  0x1d   : > { %282 = dma.hbm_to_vmem [thread:$0]  (!%p280_p0), %s124_s8, 128, %s126_s7, %s113_s9  }
  0x1e   : > { %p131_p3 = pnand %p268_p1, %p130_p2 }
  0x1f   : > { %s559_s10 = sand.u32 (!%p131_p3), 1, %s448_s14  }
  0x20   : > { %134 = sbr.rel (%p131_p3) target bundleno = 53 (0x35), region = 24  ;;  %s269_s11 = sshll.u32 (!%p131_p3), %s559_s10, 3 }
  0x21   : > { %s137_s12 = scalar_lea.sflag (!%p131_p3), [#allocation5], %s559_s10  ;;  %s140_s18 = scalar_lea.vmem (!%p131_p3), [#allocation4], %s269_s11 }
  0x25   : > { %435 = dma.done.wait (%p532_p8), %s137_s12, 128  }
  0x26   : > { %437 = vsyncadd (%p532_p8), %s137_s12, 4294967168  ;;  %s160_s19 = sld [smem:[#allocation3 + %s456_s16]]  ;;  %s272_s21 = sshll.u32 %s456_s16, 3  ;;  %v161_v0 = vld [vmem:[%s140_s18] sm:$0xff] }
  0x27   : > { %s177_s28 = scalar_lea.hbm %s608_s2, %s272_s21  ;;  %s159_s29 = scalar_lea.vmem [#allocation7], %s269_s11 }
  0x28   : > { %s179_s30 = sshll.u32 %s159_s29, 4  ;;  %s181_s3 = sshll.u32 %s177_s28, 4  ;;  %s180_s30 = int_to_ptr.vmem [resolvable:$true] %s179_s30  ;;  %s182_s3 = int_to_ptr.hbm [resolvable:$true] %s181_s3 }
  0x29   : > { %s166_s24 = scalar_lea.sflag [#allocation6], %s559_s10  ;;  %s394_s4 = sshra.s32 %s182_s3, 4  ;;  %s395_s4 = int_to_ptr.hbm [resolvable:$true] %s394_s4 }
  0x2a   : > { %s396_s5 = scalar_lea.hbm %s395_s4, 8  ;;  %s400_s7 = scalar_lea.hbm %s608_s2, 16 }
  0x2b   : > { %p397_p4 = scmp.ne.s32.totalorder %s395_s4, %s396_s5  ;;  %p401_p7 = scmp.lt.s32.totalorder %s395_s4, %s608_s2 }
  0x2c   : > { %v162_v1 = vstv %s160_s19  ;;  %p402_p8 = scmp.lt.s32.totalorder %s400_s7, %s396_s5 }
  0x2d   : > { %v163_v2 = vmul.f32 %v162_v1, %v161_v0  ;;  %p398_p5 = pnand %p397_p4, %p536_p9 }
  0x2e   : > { %p403_p10 = por %p402_p8, %p401_p7 }
  0x2f   : > { %164 = vst [vmem:[%s159_s29] sm:$0xff] %v163_v2  ;;  %p399_p6 = pneg %p398_p5 }
  0x31   : > { %p404_p13 = pnand %p403_p10, %p399_p6 }
  0x33   : > { %407 = shalt.err (!%p404_p13)
}
  0x34   : > { %277 = dma.vmem_to_hbm [thread:$0]  (%p536_p9), %s180_s30, 128, %s182_s3, %s166_s24  }
  0x35 PF: > { %s193_s10 = sand.u32 1, %s444_s13   ;;  %p284_p0 = pnand %p265_p12, %p543_p11 }
  0x36   : > { %s194_s11 = scalar_lea.sflag [#allocation6], %s193_s10 }
  0x37   : > { %p285_p1 = pneg %p284_p0 }
  0x39   : > { %439 = dma.done.wait (%p285_p1), %s194_s11, 128  }
  0x3a   : > { %441 = vsyncadd (%p285_p1), %s194_s11, 4294967168  ;;  %s26_s0 = sadd.s32 1, %s464_s0   ;;  %s613_s13 = smov %s448_s14 }
  0x3b   : > { %p23_p2 = scmp.ge.s32.totalorder %s26_s0, 4   ;;  %s614_s14 = smov %s452_s15 }
  0x3c   : > { %s615_s15 = smov %s541_s26  ;;  %s616_s16 = smov %s460_s17 }
  0x3d   : > { %s617_s17 = smov %s619_s20  ;;  %25 = sbr.rel (!%p23_p2) target bundleno = 12 (0xc), region = 69 }
  0x42   :  { %200 = vsyncpa [#allocation5], 1 }
  0x43   :  { %202 = vsyncpa [#allocation5 + $0x1], 1 }
  0x44   :  { %203 = vsyncpa [#allocation6], 1 }
  0x45   :  { %205 = vsyncpa [#allocation6 + $0x1], 1 }

</bundles_post_ra>
